<compile_context>
chip_gen: v7x
topology: tpu7x:2x2x1
jax: 0.10.0
libtpu: 0.0.40
codegen_flags: <defaults>
</compile_context>

<pallas_src>
import jax
import jax.numpy as jnp
from jax.experimental import pallas as pl
from jax.experimental.pallas import tpu as pltpu


def gcn5_kernel(a_ref, x_ref,
                w1_ref, b1_ref,
                w2_ref, b2_ref,
                w3c_ref, b3c_ref,
                out_ref):
    Bt, N, _ = a_ref.shape
    Fin = x_ref.shape[-1]
    H = w1_ref.shape[-1]
    H2 = w2_ref.shape[-1]

    a = a_ref[...]          # [Bt, N, N]   bf16 (MXU input)
    x = x_ref[...]          # [Bt, N, Fin] bf16
    w1 = w1_ref[...]        # bf16 weights
    w2 = w2_ref[...]
    w3c = w3c_ref[...]      # [2H, C_pad]  folded W3 @ Wc
    b1 = b1_ref[...]        # f32 biases
    b2 = b2_ref[...]
    b3c = b3c_ref[...]      # [1, C_pad]   folded b3 @ Wc + bc

    # ---- GraphConv 1 + ReLU:  h1 = relu(A @ X @ W1 + b1) ----
    # Pick the association so the N^2 aggregation runs on the narrower width.
    if Fin <= H:
        ax = jnp.einsum('bij,bjf->bif', a, x,
                        preferred_element_type=jnp.float32)            # [Bt,N,Fin]
        h = jnp.dot(ax.astype(jnp.bfloat16).reshape(Bt * N, Fin), w1,
                    preferred_element_type=jnp.float32)                # [Bt*N,H]
    else:
        xw = jnp.dot(x.reshape(Bt * N, Fin), w1,
                     preferred_element_type=jnp.float32)
        h = jnp.einsum('bij,bjf->bif', a,
                       xw.astype(jnp.bfloat16).reshape(Bt, N, H),
                       preferred_element_type=jnp.float32).reshape(Bt * N, H)
    h = jnp.maximum(h + b1, 0.0)                                       # f32

    # ---- GraphConv 2 + ReLU:  h2 = relu(A @ h1 @ W2 + b2) ----
    ah = jnp.einsum('bij,bjf->bif', a,
                    h.astype(jnp.bfloat16).reshape(Bt, N, H),
                    preferred_element_type=jnp.float32)                # [Bt,N,H]
    h2 = jnp.dot(ah.astype(jnp.bfloat16).reshape(Bt * N, H), w2,
                 preferred_element_type=jnp.float32)                   # [Bt*N,2H]
    h2 = jnp.maximum(h2 + b2, 0.0)                                     # f32

    # ---- GraphConv 3 fused with mean_nodes + classifier ----
    # mean_n(A @ h2 @ W3 + b3) @ Wc + bc
    #   == ((1/N) * colmean-vector-of-A @ h2) @ (W3@Wc) + (b3@Wc + bc)
    m = jnp.sum(a.astype(jnp.float32), axis=1) * (1.0 / N)             # [Bt,N]
    hg = jnp.sum(m[:, :, None] * h2.reshape(Bt, N, H2), axis=1)        # [Bt,2H] f32
    y = jnp.dot(hg.astype(jnp.bfloat16), w3c,
                preferred_element_type=jnp.float32) + b3c              # [Bt,C_pad]
    out_ref[...] = y[None, :, :]


def gcn5_forward(a_hat, x, params):
    """a_hat: [B, N, N] normalized adjacency (f32), x: [B, N, in_feats] (f32)."""
    B, N, Fin = x.shape
    w1, b1, w2, b2, w3, b3, wc, bc = params
    H = w1.shape[1]
    H2 = w2.shape[1]
    C = wc.shape[1]

    # Fold GraphConv3 weight into the classifier (exact: no activation between).
    w3c = jnp.dot(w3, wc)                      # [2H, C]
    b3c = jnp.dot(b3, wc) + bc                 # [1, C]

    # Lane-dense classifier output: pad C up to a multiple of 128.
    C_pad = ((C + 127) // 128) * 128
    w3c = jnp.pad(w3c, ((0, 0), (0, C_pad - C)))
    b3c = jnp.pad(b3c, ((0, 0), (0, C_pad - C)))

    # Pack Bt graphs per grid step so Bt*N >= 128 MXU rows; pad the batch.
    Bt = max(1, pl.cdiv(128, N))
    B_pad = pl.cdiv(B, Bt) * Bt
    if B_pad != B:
        a_hat = jnp.pad(a_hat, ((0, B_pad - B), (0, 0), (0, 0)))
        x = jnp.pad(x, ((0, B_pad - B), (0, 0), (0, 0)))
    steps = B_pad // Bt
    # NOTE: for large N (>~1024 on v7x's 64 MiB VMEM) tile the node axis and/or
    # lower Bt; the bf16 A block is 2*Bt*N*N bytes double-buffered.

    # bf16 MXU inputs; biases (and all elementwise work in-kernel) stay f32.
    a_bf = a_hat.astype(jnp.bfloat16)
    x_bf = x.astype(jnp.bfloat16)
    w1_bf = w1.astype(jnp.bfloat16)
    w2_bf = w2.astype(jnp.bfloat16)
    w3c_bf = w3c.astype(jnp.bfloat16)
    b1_f = b1.astype(jnp.float32)
    b2_f = b2.astype(jnp.float32)
    b3c_f = b3c.astype(jnp.float32)

    batch_map = lambda s: (s, 0, 0)
    shared_map = lambda s: (0, 0)

    flops_per_step = (
        2 * Bt * N * N * min(Fin, H) + 2 * Bt * N * Fin * H      # layer 1
        + 2 * Bt * N * N * H + 2 * Bt * N * H * H2               # layer 2
        + 2 * Bt * N * H2 + 2 * Bt * H2 * C_pad)                 # readout + classify
    bytes_accessed = (
        (a_bf.size + x_bf.size) * 2
        + (w1_bf.size + w2_bf.size + w3c_bf.size) * 2
        + (b1_f.size + b2_f.size + b3c_f.size) * 4
        + steps * Bt * C_pad * 4)

    out = pl.pallas_call(
        gcn5_kernel,
        out_shape=jax.ShapeDtypeStruct((steps, Bt, C_pad), jnp.float32),
        grid_spec=pltpu.PrefetchScalarGridSpec(
            num_scalar_prefetch=0,
            grid=(steps,),
            in_specs=[
                pl.BlockSpec((Bt, N, N), batch_map),       # A_hat block (Bt graphs)
                pl.BlockSpec((Bt, N, Fin), batch_map),     # X block
                pl.BlockSpec(w1_bf.shape, shared_map),     # W1
                pl.BlockSpec(b1_f.shape, shared_map),      # b1
                pl.BlockSpec(w2_bf.shape, shared_map),     # W2
                pl.BlockSpec(b2_f.shape, shared_map),      # b2
                pl.BlockSpec(w3c_bf.shape, shared_map),    # W3 @ Wc (padded)
                pl.BlockSpec(b3c_f.shape, shared_map),     # b3 @ Wc + bc (padded)
            ],
            out_specs=pl.BlockSpec((1, Bt, C_pad), batch_map),
        ),
        compiler_params=pltpu.CompilerParams(
            dimension_semantics=("parallel",)),            # shards steps across v7x TCs
        cost_estimate=pl.CostEstimate(
            flops=int(steps * flops_per_step),
            transcendentals=0,
            bytes_accessed=int(bytes_accessed)),
    )(a_bf, x_bf, w1_bf, b1_f, w2_bf, b2_f, w3c_bf, b3c_f)

    return out.reshape(B_pad, C_pad)[:B, :C]


def normalize_adjacency(adj):
    """DGL GraphConv norm='both':  D^{-1/2} A D^{-1/2} (degrees clamped to >= 1)."""
    deg = jnp.clip(jnp.sum(adj, axis=-1), 1.0, None)          # [B, N]
    d_inv_sqrt = 1.0 / jnp.sqrt(deg)
    return adj * d_inv_sqrt[:, :, None] * d_inv_sqrt[:, None, :]


def init_params(key, in_feats, h_feats, num_classes):
    ks = jax.random.split(key, 8)
    scale = 0.1
    w1 = scale * jax.random.normal(ks[0], (in_feats, h_feats), jnp.float32)
    b1 = scale * jax.random.normal(ks[1], (1, h_feats), jnp.float32)
    w2 = scale * jax.random.normal(ks[2], (h_feats, 2 * h_feats), jnp.float32)
    b2 = scale * jax.random.normal(ks[3], (1, 2 * h_feats), jnp.float32)
    w3 = scale * jax.random.normal(ks[4], (2 * h_feats, h_feats), jnp.float32)
    b3 = scale * jax.random.normal(ks[5], (1, h_feats), jnp.float32)
    wc = scale * jax.random.normal(ks[6], (h_feats, num_classes), jnp.float32)
    bc = scale * jax.random.normal(ks[7], (1, num_classes), jnp.float32)
    return (w1, b1, w2, b2, w3, b3, wc, bc)


if __name__ == "__main__":
    key = jax.random.PRNGKey(0)
    k_graph, k_feat, k_param = jax.random.split(key, 3)

    B = 2            # graphs in the batch
    N = 16           # nodes per graph
    in_feats = 8
    h_feats = 16
    num_classes = 3

    # Deterministic random undirected graphs (symmetric 0/1 adjacency, no self loops).
    rand = jax.random.uniform(k_graph, (B, N, N))
    upper = (rand > 0.6).astype(jnp.float32)
    upper = jnp.triu(upper, k=1)
    adj = upper + jnp.transpose(upper, (0, 2, 1))
    a_hat = normalize_adjacency(adj)

    x = jax.random.normal(k_feat, (B, N, in_feats), jnp.float32)
    params = init_params(k_param, in_feats, h_feats, num_classes)

    # TODO(synk): mean_nodes divides by the fixed padded node count N; for
    # DGL-equivalent ragged batches, pass per-graph node counts (scalar prefetch)
    # and divide by them instead.
    out = gcn5_forward(a_hat, x, params)
    jax.block_until_ready(out)
    assert out.shape == (B, num_classes)
    print("KERNEL_OK")
</pallas_src>

<mosaic_0001>
module attributes {stable_mosaic.version = 11 : i64} {
  func.func @gcn5_kernel(%arg0: i32, %arg1: memref<8x16x16xbf16, #tpu.memory_space<vmem>>, %arg2: memref<8x16x8xbf16, #tpu.memory_space<vmem>>, %arg3: memref<8x16xbf16, #tpu.memory_space<vmem>>, %arg4: memref<1x16xf32, #tpu.memory_space<vmem>>, %arg5: memref<16x32xbf16, #tpu.memory_space<vmem>>, %arg6: memref<1x32xf32, #tpu.memory_space<vmem>>, %arg7: memref<32x128xbf16, #tpu.memory_space<vmem>>, %arg8: memref<1x128xf32, #tpu.memory_space<vmem>>, %arg9: memref<1x8x128xf32, #tpu.memory_space<vmem>>) attributes {dimension_semantics = [#tpu.dimension_semantics<parallel>], iteration_bounds = array<i64: 1>, scalar_prefetch = 0 : i64, scratch_operands = 0 : i64, tpu.core_type = #tpu.core_type<tc>, window_params = [{transform_indices = @transform_0, window_bounds = array<i64: 8, 16, 16>}, {transform_indices = @transform_1, window_bounds = array<i64: 8, 16, 8>}, {pipeline_mode = #tpu.pipeline_mode<synchronous>, transform_indices = @transform_2, window_bounds = array<i64: 8, 16>}, {pipeline_mode = #tpu.pipeline_mode<synchronous>, transform_indices = @transform_3, window_bounds = array<i64: 1, 16>}, {pipeline_mode = #tpu.pipeline_mode<synchronous>, transform_indices = @transform_4, window_bounds = array<i64: 16, 32>}, {pipeline_mode = #tpu.pipeline_mode<synchronous>, transform_indices = @transform_5, window_bounds = array<i64: 1, 32>}, {pipeline_mode = #tpu.pipeline_mode<synchronous>, transform_indices = @transform_6, window_bounds = array<i64: 32, 128>}, {pipeline_mode = #tpu.pipeline_mode<synchronous>, transform_indices = @transform_7, window_bounds = array<i64: 1, 128>}, {transform_indices = @transform_8, window_bounds = array<i64: 1, 8, 128>}]} {
    %c0 = arith.constant 0 : index
    %c0_0 = arith.constant 0 : index
    %c0_1 = arith.constant 0 : index
    %0 = vector.load %arg1[%c0, %c0_0, %c0_1] : memref<8x16x16xbf16, #tpu.memory_space<vmem>>, vector<8x16x16xbf16>
    %c0_2 = arith.constant 0 : index
    %c0_3 = arith.constant 0 : index
    %c0_4 = arith.constant 0 : index
    %1 = vector.load %arg2[%c0_2, %c0_3, %c0_4] : memref<8x16x8xbf16, #tpu.memory_space<vmem>>, vector<8x16x8xbf16>
    %c0_5 = arith.constant 0 : index
    %c0_6 = arith.constant 0 : index
    %2 = vector.load %arg3[%c0_5, %c0_6] : memref<8x16xbf16, #tpu.memory_space<vmem>>, vector<8x16xbf16>
    %c0_7 = arith.constant 0 : index
    %c0_8 = arith.constant 0 : index
    %3 = vector.load %arg5[%c0_7, %c0_8] : memref<16x32xbf16, #tpu.memory_space<vmem>>, vector<16x32xbf16>
    %c0_9 = arith.constant 0 : index
    %c0_10 = arith.constant 0 : index
    %4 = vector.load %arg7[%c0_9, %c0_10] : memref<32x128xbf16, #tpu.memory_space<vmem>>, vector<32x128xbf16>
    %c0_11 = arith.constant 0 : index
    %c0_12 = arith.constant 0 : index
    %5 = vector.load %arg4[%c0_11, %c0_12] : memref<1x16xf32, #tpu.memory_space<vmem>>, vector<1x16xf32>
    %c0_13 = arith.constant 0 : index
    %c0_14 = arith.constant 0 : index
    %6 = vector.load %arg6[%c0_13, %c0_14] : memref<1x32xf32, #tpu.memory_space<vmem>>, vector<1x32xf32>
    %c0_15 = arith.constant 0 : index
    %c0_16 = arith.constant 0 : index
    %7 = vector.load %arg8[%c0_15, %c0_16] : memref<1x128xf32, #tpu.memory_space<vmem>>, vector<1x128xf32>
    "tpu.trace_start"() <{level = 10 : i32, message = "bij,bjf->bif"}> : () -> ()
    %cst = arith.constant dense<0.000000e+00> : vector<8x16x8xf32>
    %8 = tpu.matmul %0, %1, %cst {dimension_numbers = #tpu.dot_dimension_numbers<[2], [1], [1], [2], [0, 0, 0, 1, 1, 2], [0], [0]>} : vector<8x16x16xbf16>, vector<8x16x8xbf16>, vector<8x16x8xf32> -> vector<8x16x8xf32>
    "tpu.trace_stop"() : () -> ()
    %9 = arith.truncf %8 : vector<8x16x8xf32> to vector<8x16x8xbf16>
    %10 = vector.shape_cast %9 : vector<8x16x8xbf16> to vector<128x8xbf16>
    %cst_17 = arith.constant dense<0.000000e+00> : vector<128x16xf32>
    %11 = tpu.matmul %10, %2, %cst_17 {dimension_numbers = #tpu.dot_dimension_numbers<[1], [0], [0], [1], [0, 0, 1, 1], [], []>} : vector<128x8xbf16>, vector<8x16xbf16>, vector<128x16xf32> -> vector<128x16xf32>
    %12 = vector.broadcast %5 : vector<1x16xf32> to vector<128x16xf32>
    %13 = arith.addf %11, %12 : vector<128x16xf32>
    %cst_18 = arith.constant 0.000000e+00 : f32
    %14 = vector.broadcast %cst_18 : f32 to vector<128x16xf32>
    %15 = arith.maximumf %13, %14 : vector<128x16xf32>
    %16 = arith.truncf %15 : vector<128x16xf32> to vector<128x16xbf16>
    %17 = vector.shape_cast %16 : vector<128x16xbf16> to vector<8x16x16xbf16>
    "tpu.trace_start"() <{level = 10 : i32, message = "bij,bjf->bif"}> : () -> ()
    %cst_19 = arith.constant dense<0.000000e+00> : vector<8x16x16xf32>
    %18 = tpu.matmul %0, %17, %cst_19 {dimension_numbers = #tpu.dot_dimension_numbers<[2], [1], [1], [2], [0, 0, 0, 1, 1, 2], [0], [0]>} : vector<8x16x16xbf16>, vector<8x16x16xbf16>, vector<8x16x16xf32> -> vector<8x16x16xf32>
    "tpu.trace_stop"() : () -> ()
    %19 = arith.truncf %18 : vector<8x16x16xf32> to vector<8x16x16xbf16>
    %20 = vector.shape_cast %19 : vector<8x16x16xbf16> to vector<128x16xbf16>
    %cst_20 = arith.constant dense<0.000000e+00> : vector<128x32xf32>
    %21 = tpu.matmul %20, %3, %cst_20 {dimension_numbers = #tpu.dot_dimension_numbers<[1], [0], [0], [1], [0, 0, 1, 1], [], []>} : vector<128x16xbf16>, vector<16x32xbf16>, vector<128x32xf32> -> vector<128x32xf32>
    %22 = vector.broadcast %6 : vector<1x32xf32> to vector<128x32xf32>
    %23 = arith.addf %21, %22 : vector<128x32xf32>
    %cst_21 = arith.constant 0.000000e+00 : f32
    %24 = vector.broadcast %cst_21 : f32 to vector<128x32xf32>
    %25 = arith.maximumf %23, %24 : vector<128x32xf32>
    %26 = arith.extf %0 : vector<8x16x16xbf16> to vector<8x16x16xf32>
    %cst_22 = arith.constant dense<0.000000e+00> : vector<8x16xf32>
    %27 = vector.multi_reduction <add>, %26, %cst_22 [1] : vector<8x16x16xf32> to vector<8x16xf32>
    %cst_23 = arith.constant 6.250000e-02 : f32
    %28 = vector.broadcast %cst_23 : f32 to vector<8x16xf32>
    %29 = arith.mulf %27, %28 : vector<8x16xf32>
    %30 = vector.shape_cast %29 : vector<8x16xf32> to vector<8x16x1xf32>
    %31 = vector.shape_cast %25 : vector<128x32xf32> to vector<8x16x32xf32>
    %32 = vector.broadcast %30 : vector<8x16x1xf32> to vector<8x16x32xf32>
    %33 = arith.mulf %32, %31 : vector<8x16x32xf32>
    %cst_24 = arith.constant dense<0.000000e+00> : vector<8x32xf32>
    %34 = vector.multi_reduction <add>, %33, %cst_24 [1] : vector<8x16x32xf32> to vector<8x32xf32>
    %35 = arith.truncf %34 : vector<8x32xf32> to vector<8x32xbf16>
    %cst_25 = arith.constant dense<0.000000e+00> : vector<8x128xf32>
    %36 = tpu.matmul %35, %4, %cst_25 {dimension_numbers = #tpu.dot_dimension_numbers<[1], [0], [0], [1], [0, 0, 1, 1], [], []>} : vector<8x32xbf16>, vector<32x128xbf16>, vector<8x128xf32> -> vector<8x128xf32>
    %37 = vector.broadcast %7 : vector<1x128xf32> to vector<8x128xf32>
    %38 = arith.addf %36, %37 : vector<8x128xf32>
    %39 = vector.shape_cast %38 : vector<8x128xf32> to vector<1x8x128xf32>
    %c0_26 = arith.constant 0 : index
    %c0_27 = arith.constant 0 : index
    %c0_28 = arith.constant 0 : index
    %40 = vector.load %arg9[%c0_26, %c0_27, %c0_28] : memref<1x8x128xf32, #tpu.memory_space<vmem>>, vector<1x8x128xf32>
    tpu.vector_store %arg9[%c0_26, %c0_27, %c0_28], %39 {strides = array<i32>} : memref<1x8x128xf32, #tpu.memory_space<vmem>>, vector<1x8x128xf32>,
    return
  }
  func.func @transform_0(%arg0: i32) -> (i32, i32, i32) {
    %c0_i32 = arith.constant 0 : i32
    %c0_i32_0 = arith.constant 0 : i32
    %c0_i32_1 = arith.constant 0 : i32
    return %arg0, %c0_i32, %c0_i32_0 : i32, i32, i32
  }
  func.func @transform_1(%arg0: i32) -> (i32, i32, i32) {
    %c0_i32 = arith.constant 0 : i32
    %c0_i32_0 = arith.constant 0 : i32
    %c0_i32_1 = arith.constant 0 : i32
    return %arg0, %c0_i32, %c0_i32_0 : i32, i32, i32
  }
  func.func @transform_2(%arg0: i32) -> (i32, i32) {
    %c0_i32 = arith.constant 0 : i32
    %c0_i32_0 = arith.constant 0 : i32
    %c0_i32_1 = arith.constant 0 : i32
    return %c0_i32, %c0_i32_0 : i32, i32
  }
  func.func @transform_3(%arg0: i32) -> (i32, i32) {
    %c0_i32 = arith.constant 0 : i32
    %c0_i32_0 = arith.constant 0 : i32
    %c0_i32_1 = arith.constant 0 : i32
    return %c0_i32, %c0_i32_0 : i32, i32
  }
  func.func @transform_4(%arg0: i32) -> (i32, i32) {
    %c0_i32 = arith.constant 0 : i32
    %c0_i32_0 = arith.constant 0 : i32
    %c0_i32_1 = arith.constant 0 : i32
    return %c0_i32, %c0_i32_0 : i32, i32
  }
  func.func @transform_5(%arg0: i32) -> (i32, i32) {
    %c0_i32 = arith.constant 0 : i32
    %c0_i32_0 = arith.constant 0 : i32
    %c0_i32_1 = arith.constant 0 : i32
    return %c0_i32, %c0_i32_0 : i32, i32
  }
  func.func @transform_6(%arg0: i32) -> (i32, i32) {
    %c0_i32 = arith.constant 0 : i32
    %c0_i32_0 = arith.constant 0 : i32
    %c0_i32_1 = arith.constant 0 : i32
    return %c0_i32, %c0_i32_0 : i32, i32
  }
  func.func @transform_7(%arg0: i32) -> (i32, i32) {
    %c0_i32 = arith.constant 0 : i32
    %c0_i32_0 = arith.constant 0 : i32
    %c0_i32_1 = arith.constant 0 : i32
    return %c0_i32, %c0_i32_0 : i32, i32
  }
  func.func @transform_8(%arg0: i32) -> (i32, i32, i32) {
    %c0_i32 = arith.constant 0 : i32
    %c0_i32_0 = arith.constant 0 : i32
    %c0_i32_1 = arith.constant 0 : i32
    return %arg0, %c0_i32, %c0_i32_0 : i32, i32, i32
  }
}

</mosaic_0001>

<bundles_post_ra>
// kernel: tpu_custom_call.1
= control target key start
LH: loop header
LB: loop body
LE: loop exit
PB: predicated region body
PF: predicated region fallthrough
CT: control target
= control target key end

     0   :  { %v1822_v1 = vmov 0.0   ;;  %vm1823_vm0 = vmmov 0   ;;  %vm84_vm1 = vcmask 130048   ;;  %s2157_s0 = inlined_call_operand.vmem [shape: bf16[8,16,16], index: 0, kind: input, shape index: {}]   ;;  %s2158_s1 = inlined_call_operand.vmem [shape: bf16[8,16,8], index: 1, kind: input, shape index: {}]   ;;  %s2159_s2 = inlined_call_operand.vmem [shape: bf16[8,16], index: 2, kind: input, shape index: {}]   ;;  %s2160_s3 = inlined_call_operand.vmem [shape: f32[1,16], index: 3, kind: input, shape index: {}]   ;;  %s2161_s4 = inlined_call_operand.vmem [shape: bf16[16,32], index: 4, kind: input, shape index: {}]   ;;  %s2162_s5 = inlined_call_operand.vmem [shape: f32[1,32], index: 5, kind: input, shape index: {}]   ;;  %s2163_s6 = inlined_call_operand.vmem [shape: bf16[32,128], index: 6, kind: input, shape index: {}]   ;;  %s2164_s7 = inlined_call_operand.vmem [shape: f32[1,128], index: 7, kind: input, shape index: {}]   ;;  %s2165_s8 = inlined_call_operand.hbm [shape: f32[1,8,128], index: 8, kind: output, shape index: {}]  }
   0x1   :  { %v1771_v0 = vld [vmem:[%s2158_s1] sm:$0xff]   ;;  %1627 = vmatprep.subr.bf16.mxu1 %v1822_v1  ;;  %1639 = vmatprep.subr.bf16.mxu0 %v1822_v1  ;;  %v1773_v3 = vld [vmem:[%s2158_s1 + $0x8] sm:$0xff]   ;;  %v1775_v4 = vld [vmem:[%s2158_s1 + $0x10] sm:$0xff]  }
   0x2   :  { %v1877_v2 = vld [vmem:[%s2157_s0] sm:$0xff]   ;;  %1628 = vmatpush3.bf16.msra.mxu1 %v1771_v0  ;;  %1629 = vmatprep.mubr.msk.bf16.mxu1 %vm1823_vm0, %v1822_v1  ;;  %v1894_v5 = vld [vmem:[%s2157_s0 + $0x10] sm:$0xff]   ;;  %v1903_v6 = vld [vmem:[%s2157_s0 + $0x8] sm:$0xff]  }
   0x3   :  { %1633 = vmatprep.subr.bf16.mxu1 %v1822_v1  ;;  %1641 = vmatprep.mubr.msk.bf16.mxu0 %vm1823_vm0, %v1822_v1  ;;  %v1779_v7 = vld [vmem:[%s2158_s1 + $0x20] sm:$0xff]   ;;  %v1777_v9 = vld [vmem:[%s2158_s1 + $0x18] sm:$0xff]  }
   0x4   :  { %1640 = vmatpush3.bf16.msra.mxu0 %v1775_v4  ;;  %v1917_v8 = vld [vmem:[%s2157_s0 + $0x20] sm:$0xff]  }
   0x5   :  { %1630 = vmatmul.mubr.msk.bf16.vlgmr.msra.gmra.mrb[0].mxu1 %vm84_vm1, %v1877_v2  ;;  %1651 = vmatprep.subr.bf16.mxu0 %v1822_v1 }
   0x6   :  { %1634 = vmatpush3.bf16.msra.mxu1 %v1773_v3  ;;  %1635 = vmatprep.mubr.msk.bf16.mxu1 %vm1823_vm0, %v1822_v1 }
   0x7   :  { %1645 = vmatprep.subr.bf16.mxu1 %v1822_v1  ;;  %1642 = vmatmul.mubr.msk.bf16.vlgmr.msra.gmra.mrb[0].mxu0 %vm84_vm1, %v1894_v5 }
   0x8   :  { %1652 = vmatpush3.bf16.msra.mxu0 %v1779_v7  ;;  %1653 = vmatprep.mubr.msk.bf16.mxu0 %vm1823_vm0, %v1822_v1 }
   0x9   :  { %1663 = vmatprep.subr.bf16.mxu0 %v1822_v1 }
   0xa   :  { %13 = vsyncpa [#allocation3], 0  ;;  %v1783_v10 = vld [vmem:[%s2158_s1 + $0x30] sm:$0xff]   ;;  %v1933_v11 = vld [vmem:[%s2157_s0 + $0x18] sm:$0xff]   ;;  %vm553_vm2 = vcmask 1043456   ;;  %vm528_vm3 = vcmask 64512  }
   0xb   :  { %v1943_v12 = vld [vmem:[%s2157_s0 + $0x30] sm:$0xff]   ;;  %v1781_v13 = vld [vmem:[%s2158_s1 + $0x28] sm:$0xff]   ;;  %v1784_v15 = vld [vmem:[%s2158_s1 + $0x38] sm:$0xff]   ;;  %vm1331_vm4 = vcmask 261120   ;;  %vm1434_vm5 = vcmask 1041409   ;;  %vm1436_vm6 = vcmask 1042434  }
   0xc   :  { %v1955_v14 = vld [vmem:[%s2157_s0 + $0x28] sm:$0xff]   ;;  %v1970_v16 = vld [vmem:[%s2157_s0 + $0x38] sm:$0xff]   ;;  %v63_v17 = vld [vmem:[%s2159_s2] sm:$0xf]  ;;  %vm1438_vm7 = vcmask 1043459   ;;  %vm1440_vm8 = vcmask 1044484  }
   0xd   :  { %1636 = vmatmul.mubr.msk.bf16.vlgmr.msra.gmra.mrb[4].mxu1 %vm84_vm1, %v1903_v6  ;;  %v555_v18 = vsel %vm553_vm2, %v63_v17, 0  ;;  %v1994_v59 = vld [vmem:[%s2160_s3] ss:$0 sm:$0xff]  ;;  %vm1442_vm9 = vcmask 1045509   ;;  %vm1444_vm10 = vcmask 1046534   ;;  %vm1446_vm11 = vcmask 1047559  }
   0xe   :  { %1646 = vmatpush3.bf16.msra.mxu1 %v1777_v9  ;;  %1647 = vmatprep.mubr.msk.bf16.mxu1 %vm1823_vm0, %v1822_v1  ;;  %s1824_s22 = smov [#allocation2]  }
   0xf   :  { %1657 = vmatprep.subr.bf16.mxu1 %v1822_v1  ;;  %1654 = vmatmul.mubr.msk.bf16.vlgmr.msra.gmra.mrb[4].mxu0 %vm84_vm1, %v1917_v8  ;;  %s1511_s23 = sshll.u32 %s1824_s22, 4  ;;  %s1512_s23 = int_to_ptr.vmem [resolvable:$true] %s1511_s23 }
  0x10   :  { %1664 = vmatpush3.bf16.msra.mxu0 %v1783_v10  ;;  %1665 = vmatprep.mubr.msk.bf16.mxu0 %vm1823_vm0, %v1822_v1  ;;  %s1798_s24 = scalar_lea.vmem %s1512_s23, 128  ;;  %p1803_p1 = scmp.lt.s32.totalorder %s1512_s23, %s1512_s23 }
  0x11   :  { %1767 = vmatprep.subr.msk.bf16.mxu0 %vm553_vm2, %v63_v17  ;;  %p1799_p0 = scmp.ne.s32.totalorder %s1512_s23, %s1798_s24  ;;  %p1804_p2 = scmp.lt.s32.totalorder %s1798_s24, %s1798_s24 }
  0x13   :  { %p1805_p3 = por %p1804_p2, %p1803_p1 }
  0x15   :  { %1648 = vmatmul.mubr.msk.bf16.vlgmr.msra.gmra.mrb[8].mxu1 %vm84_vm1, %v1933_v11  ;;  %p1806_p4 = pnand %p1805_p3, %p1799_p0 }
  0x16   :  { %1658 = vmatpush3.bf16.msra.mxu1 %v1781_v13  ;;  %1659 = vmatprep.mubr.msk.bf16.mxu1 %vm1823_vm0, %v1822_v1 }
  0x17   :  { %1669 = vmatprep.subr.bf16.mxu1 %v1822_v1  ;;  %1666 = vmatmul.mubr.msk.bf16.vlgmr.msra.gmra.mrb[8].mxu0 %vm84_vm1, %v1943_v12 }
  0x18   :  { %1676 = vmatpush3.bf16.msra.mxu0 %v555_v18 }
  0x19   :  { %1717 = vmatprep.subr.bf16.mxu0 %v1822_v1 }
  0x1d   :  { %1660 = vmatmul.mubr.msk.bf16.vlgmr.msra.gmra.mrb[12].mxu1 %vm84_vm1, %v1955_v14 }
  0x1e   :  { %1670 = vmatpush3.bf16.msra.mxu1 %v1784_v15  ;;  %1671 = vmatprep.mubr.msk.bf16.mxu1 %vm1823_vm0, %v1822_v1 }
  0x1f   :  { %1693 = vmatprep.subr.bf16.mxu1 %v1822_v1 }
  0x25   :  { %1672 = vmatmul.mubr.msk.bf16.vlgmr.msra.gmra.mrb[16].mxu1 %vm84_vm1, %v1970_v16 }
  0x26   :  { %1695 = vmatprep.mubr.msk.bf16.mxu1 %vm1823_vm0, %v1822_v1 }
  0xd8   :  { %v122_v19 = vpop.f32.mrb[0].mxu1 }
  0xd9   :  { %v1631_v20 = vpop.f32.mrb[1].mxu1 }
  0xda   :  { %v125_v21 = vpop.f32.mrb[2].mxu1  ;;  %v232_v24 = vpop.f32.mrb[0].mxu0 }
  0xdb   :  { %v514_v22 = vpack.c.bf16 %v125_v21, %v122_v19  ;;  %v1632_v23 = vpop.f32.mrb[3].mxu1  ;;  %v1643_v25 = vpop.f32.mrb[1].mxu0 }
  0xdc   :  { %v235_v26 = vpop.f32.mrb[2].mxu0 }
  0xdd   :  { %1677 = vmatprep.mubr.msk.bf16.mxu0 %vm528_vm3, %v514_v22  ;;  %v516_v27 = vpack.c.bf16 %v235_v26, %v232_v24  ;;  %v1644_v28 = vpop.f32.mrb[3].mxu0 }
  0xe0   :  { %v177_v29 = vpop.f32.mrb[4].mxu1 }
  0xe1   :  { %v1637_v30 = vpop.f32.mrb[5].mxu1 }
  0xe2   :  { %v180_v31 = vpop.f32.mrb[6].mxu1  ;;  %v342_v34 = vpop.f32.mrb[4].mxu0 }
  0xe3   :  { %v515_v32 = vpack.c.bf16 %v180_v31, %v177_v29  ;;  %v1638_v33 = vpop.f32.mrb[7].mxu1  ;;  %v1655_v35 = vpop.f32.mrb[5].mxu0 }
  0xe4   :  { %v345_v36 = vpop.f32.mrb[6].mxu0 }
  0xe5   :  { %1678 = vmatmul.mubr.msk.bf16.vlgmr.msra.gmra.mrb[12].mxu0 %vm528_vm3, %v515_v32  ;;  %v518_v37 = vpack.c.bf16 %v345_v36, %v342_v34  ;;  %v1656_v38 = vpop.f32.mrb[7].mxu0 }
  0xe6   :  { %1681 = vmatprep.mubr.msk.bf16.mxu0 %vm528_vm3, %v516_v27 }
  0xe8   :  { %v287_v39 = vpop.f32.mrb[8].mxu1 }
  0xe9   :  { %v1649_v40 = vpop.f32.mrb[9].mxu1 }
  0xea   :  { %v290_v41 = vpop.f32.mrb[10].mxu1  ;;  %v452_v44 = vpop.f32.mrb[8].mxu0 }
  0xeb   :  { %v517_v42 = vpack.c.bf16 %v290_v41, %v287_v39  ;;  %v1650_v43 = vpop.f32.mrb[11].mxu1  ;;  %v1667_v45 = vpop.f32.mrb[9].mxu0 }
  0xec   :  { %v455_v46 = vpop.f32.mrb[10].mxu0 }
  0xed   :  { %1682 = vmatmul.mubr.msk.bf16.gmra.mrb[16].mxu0 %vm528_vm3, %v517_v42  ;;  %v520_v47 = vpack.c.bf16 %v455_v46, %v452_v44  ;;  %v1668_v48 = vpop.f32.mrb[11].mxu0 }
  0xee   :  { %1685 = vmatprep.mubr.msk.bf16.mxu0 %vm528_vm3, %v518_v37 }
  0xf0   :  { %v397_v49 = vpop.f32.mrb[12].mxu1 }
  0xf1   :  { %v1661_v50 = vpop.f32.mrb[13].mxu1 }
  0xf2   :  { %v400_v51 = vpop.f32.mrb[14].mxu1 }
  0xf3   :  { %v519_v52 = vpack.c.bf16 %v400_v51, %v397_v49  ;;  %v1662_v53 = vpop.f32.mrb[15].mxu1 }
  0xf5   :  { %1686 = vmatmul.mubr.msk.bf16.gmra.mrb[20].mxu0 %vm528_vm3, %v519_v52 }
  0xf6   :  { %1689 = vmatprep.mubr.msk.bf16.mxu0 %vm528_vm3, %v520_v47 }
  0xf8   :  { %v507_v54 = vpop.f32.mrb[16].mxu1 }
  0xf9   :  { %v1673_v55 = vpop.f32.mrb[17].mxu1 }
  0xfa   :  { %v510_v56 = vpop.f32.mrb[18].mxu1 }
  0xfb   :  { %v521_v57 = vpack.c.bf16 %v510_v56, %v507_v54  ;;  %v1674_v58 = vpop.f32.mrb[19].mxu1 }
  0xfd   :  { %1690 = vmatmul.mubr.msk.bf16.gmra.mrb[24].mxu0 %vm528_vm3, %v521_v57 }
  0xfe   :  { %1719 = vmatprep.mubr.msk.bf16.mxu0 %vm1823_vm0, %v1822_v1 }
 0x1b8   :  { %v1679_v60 = vpop.f32.mrb[12].mxu0 }
 0x1b9   :  { %v600_v61 = vadd.f32 %v1679_v60, %v1994_v59  ;;  %v591_v62 = vpop.f32.mrb[13].mxu0 }
 0x1ba   :  { %v592_v63 = vadd.f32 %v1994_v59, %v591_v62  ;;  %v1680_v0 = vpop.f32.mrb[14].mxu0  ;;  %v1163_v62 = vunpack.c.l.bf16 %v1877_v2 }
 0x1bb   :  { %v603_v3 = vadd.f32 %v1680_v0, %v1994_v59  ;;  %v594_v4 = vpop.f32.mrb[15].mxu0  ;;  %v656_v9 = vmax.f32 %v600_v61, 0.0  ;;  %v1167_v0 = vunpack.c.l.bf16 %v1894_v5 }
 0x1bc   :  { %v595_v7 = vadd.f32 %v1994_v59, %v594_v4  ;;  %v654_v13 = vmax.f32 %v592_v63, 0.0  ;;  %v1164_v63 = vunpack.c.h.bf16 %v1877_v2  ;;  %v1165_v4 = vunpack.c.l.bf16 %v1903_v6 }
 0x1bd   :  { %v657_v10 = vmax.f32 %v603_v3, 0.0  ;;  %v1168_v3 = vunpack.c.h.bf16 %v1894_v5 }
 0x1be   :  { %v655_v15 = vmax.f32 %v595_v7, 0.0  ;;  %v1166_v7 = vunpack.c.h.bf16 %v1903_v6 }
 0x1bf   :  { %v671_v17 = vpack.c.bf16 %v657_v10, %v656_v9  ;;  %v1179_v9 = vsel %vm84_vm1, %v1163_v62, 0.0  ;;  %v1180_v10 = vsel %vm84_vm1, %v1164_v63, 0.0  ;;  %v1178_v62 = vunpack.c.h.bf16 %v1970_v16 }
 0x1c0   :  { %v670_v18 = vpack.c.bf16 %v655_v15, %v654_v13  ;;  %v1683_v19 = vpop.f32.mrb[16].mxu0  ;;  %v1181_v13 = vadd.f32 %v1180_v10, %v1179_v9  ;;  %v1197_v15 = vsel %vm84_vm1, %v1167_v0, 0.0 }
 0x1c1   :  { %v616_v20 = vadd.f32 %v1683_v19, %v1994_v59  ;;  %v607_v21 = vpop.f32.mrb[17].mxu0  ;;  %v1189_v19 = vsel %vm84_vm1, %v1166_v7, 0.0 }
 0x1c2   :  { %v608_v22 = vadd.f32 %v1994_v59, %v607_v21  ;;  %v1684_v23 = vpop.f32.mrb[18].mxu0  ;;  %1694 = vmatpush3.bf16.msra.mxu1 %v670_v18  ;;  %v1169_v18 = vunpack.c.l.bf16 %v1933_v11 }
 0x1c3   :  { %v660_v24 = vmax.f32 %v616_v20, 0.0  ;;  %v619_v25 = vadd.f32 %v1684_v23, %v1994_v59  ;;  %v610_v26 = vpop.f32.mrb[19].mxu0  ;;  %1699 = vmatprep.subr.bf16.mxu1 %v1822_v1  ;;  %v1170_v20 = vunpack.c.h.bf16 %v1933_v11  ;;  %v1171_v23 = vunpack.c.l.bf16 %v1917_v8 }
 0x1c4   :  { %v658_v27 = vmax.f32 %v608_v22, 0.0  ;;  %v611_v28 = vadd.f32 %v1994_v59, %v610_v26  ;;  %v1206_v22 = vsel %vm84_vm1, %v1169_v18, 0.0  ;;  %v1172_v26 = vunpack.c.h.bf16 %v1917_v8 }
 0x1c5   :  { %v661_v29 = vmax.f32 %v619_v25, 0.0  ;;  %1696 = vmatmul.mubr.msk.bf16.vlgmr.msra.gmra.mrb[20].mxu1 %vm84_vm1, %v1877_v2  ;;  %v1188_v2 = vsel %vm84_vm1, %v1165_v4, 0.0  ;;  %v1207_v25 = vsel %vm84_vm1, %v1170_v20, 0.0 }
 0x1c6   :  { %v659_v30 = vmax.f32 %v611_v28, 0.0  ;;  %1700 = vmatpush3.bf16.msra.mxu1 %v671_v17  ;;  %1701 = vmatprep.mubr.msk.bf16.mxu1 %vm1823_vm0, %v1822_v1  ;;  %v1198_v17 = vsel %vm84_vm1, %v1168_v3, 0.0  ;;  %v1190_v21 = vadd.f32 %v1189_v19, %v1188_v2 }
 0x1c7   :  { %v673_v31 = vpack.c.bf16 %v661_v29, %v660_v24  ;;  %1705 = vmatprep.subr.bf16.mxu1 %v1822_v1 }
 0x1c8   :  { %v672_v32 = vpack.c.bf16 %v659_v30, %v658_v27  ;;  %v1687_v33 = vpop.f32.mrb[20].mxu0  ;;  %v1173_v27 = vunpack.c.l.bf16 %v1955_v14  ;;  %v1191_v28 = vrot.slane %v1190_v21, 4  ;;  %v1208_v30 = vadd.f32 %v1207_v25, %v1206_v22 }
 0x1c9   :  { %v632_v34 = vadd.f32 %v1687_v33, %v1994_v59  ;;  %v623_v35 = vpop.f32.mrb[21].mxu0  ;;  %v1174_v33 = vunpack.c.h.bf16 %v1955_v14 }
 0x1ca   :  { %v624_v36 = vadd.f32 %v1994_v59, %v623_v35  ;;  %v1688_v37 = vpop.f32.mrb[22].mxu0  ;;  %v1192_v35 = vadd.f32 %v1191_v28, %v1190_v21 }
 0x1cb   :  { %v664_v38 = vmax.f32 %v632_v34, 0.0  ;;  %v635_v39 = vadd.f32 %v1688_v37, %v1994_v59  ;;  %v626_v40 = vpop.f32.mrb[23].mxu0  ;;  %v1224_v34 = vsel %vm84_vm1, %v1173_v27, 0.0  ;;  %v1209_v37 = vrot.slane %v1208_v30, 4 }
 0x1cc   :  { %v662_v41 = vmax.f32 %v624_v36, 0.0  ;;  %v627_v42 = vadd.f32 %v1994_v59, %v626_v40  ;;  %v1175_v40 = vunpack.c.l.bf16 %v1943_v12 }
 0x1cd   :  { %v665_v43 = vmax.f32 %v635_v39, 0.0  ;;  %1702 = vmatmul.mubr.msk.bf16.vlgmr.msra.gmra.mrb[24].mxu1 %vm84_vm1, %v1903_v6  ;;  %v1182_v6 = vrot.slane %v1181_v13, 4 }
 0x1ce   :  { %v663_v44 = vmax.f32 %v627_v42, 0.0  ;;  %1706 = vmatpush3.bf16.msra.mxu1 %v672_v32  ;;  %1707 = vmatprep.mubr.msk.bf16.mxu1 %vm1823_vm0, %v1822_v1  ;;  %v1193_v42 = vrot.slane %v1192_v35, 2 }
 0x1cf   :  { %v675_v45 = vpack.c.bf16 %v665_v43, %v664_v38  ;;  %1711 = vmatprep.subr.bf16.mxu1 %v1822_v1  ;;  %v1183_v29 = vadd.f32 %v1182_v6, %v1181_v13 }
 0x1d0   :  { %v674_v46 = vpack.c.bf16 %v663_v44, %v662_v41  ;;  %v1691_v47 = vpop.f32.mrb[24].mxu0  ;;  %v1176_v41 = vunpack.c.h.bf16 %v1943_v12  ;;  %v1210_v44 = vadd.f32 %v1209_v37, %v1208_v30 }
 0x1d1   :  { %v648_v48 = vadd.f32 %v1691_v47, %v1994_v59  ;;  %v639_v49 = vpop.f32.mrb[25].mxu0  ;;  %v1184_v36 = vrot.slane %v1183_v29, 2 }
 0x1d2   :  { %1718 = vmatpush3.bf16.msra.mxu0 %v674_v46  ;;  %v640_v50 = vadd.f32 %v1994_v59, %v639_v49  ;;  %v1692_v51 = vpop.f32.mrb[26].mxu0  ;;  %v1194_v49 = vadd.f32 %v1193_v42, %v1192_v35 }
 0x1d3   :  { %v668_v52 = vmax.f32 %v648_v48, 0.0  ;;  %v651_v53 = vadd.f32 %v1692_v51, %v1994_v59  ;;  %v642_v54 = vpop.f32.mrb[27].mxu0  ;;  %1729 = vmatprep.subr.bf16.mxu0 %v1822_v1  ;;  %v1185_v43 = vadd.f32 %v1184_v36, %v1183_v29  ;;  %v1234_v48 = vsel %vm84_vm1, %v1176_v41, 0.0 }
 0x1d4   :  { %v666_v55 = vmax.f32 %v640_v50, 0.0  ;;  %v643_v56 = vadd.f32 %v1994_v59, %v642_v54  ;;  %v1787_v59 = vld [vmem:[%s2161_s4] sm:$0xff]   ;;  %v1211_v51 = vrot.slane %v1210_v44, 2 }
 0x1d5   :  { %1708 = vmatmul.mubr.msk.bf16.vlgmr.msra.gmra.mrb[28].mxu1 %vm84_vm1, %v1894_v5  ;;  %v669_v57 = vmax.f32 %v651_v53, 0.0  ;;  %1720 = vmatmul.mubr.msk.bf16.vlgmr.msra.gmra.mrb[28].mxu0 %vm84_vm1, %v1917_v8  ;;  %v1199_v5 = vadd.f32 %v1198_v17, %v1197_v15  ;;  %v1225_v8 = vsel %vm84_vm1, %v1174_v33, 0.0  ;;  %v1186_v50 = vrot.slane %v1185_v43, 1 }
 0x1d6   :  { %1712 = vmatpush3.bf16.msra.mxu1 %v673_v31  ;;  %1713 = vmatprep.mubr.msk.bf16.mxu1 %vm1823_vm0, %v1822_v1  ;;  %v667_v58 = vmax.f32 %v643_v56, 0.0  ;;  %v1215_v31 = vsel %vm84_vm1, %v1171_v23, 0.0  ;;  %v1226_v47 = vadd.f32 %v1225_v8, %v1224_v34  ;;  %v1177_v56 = vunpack.c.l.bf16 %v1970_v16 }
 0x1d7   :  { %1723 = vmatprep.subr.bf16.mxu1 %v1822_v1  ;;  %v677_v60 = vpack.c.bf16 %v669_v57, %v668_v52  ;;  %1731 = vmatprep.mubr.msk.bf16.mxu0 %vm1823_vm0, %v1822_v1  ;;  %v1200_v24 = vrot.slane %v1199_v5, 4  ;;  %v1187_v57 = vadd.f32 %v1186_v50, %v1185_v43  ;;  %v1243_v17 = vsel %vm84_vm1, %v1178_v62, 0.0 }
 0x1d8   :  { %v676_v61 = vpack.c.bf16 %v667_v58, %v666_v55  ;;  %v1227_v54 = vrot.slane %v1226_v47, 4  ;;  %v1212_v58 = vadd.f32 %v1211_v51, %v1210_v44  ;;  %v1242_v9 = vsel %vm84_vm1, %v1177_v56, 0.0 }
 0x1d9   :  { %v1201_v32 = vadd.f32 %v1200_v24, %v1199_v5  ;;  %v1251_v0 = vmul.f32 0.0625, %v1187_v57  ;;  %v1244_v18 = vadd.f32 %v1243_v17, %v1242_v9 }
 0x1da   :  { %1730 = vmatpush3.bf16.msra.mxu0 %v676_v61  ;;  %v1228_v61 = vadd.f32 %v1227_v54, %v1226_v47  ;;  %v1213_v4 = vrot.slane %v1212_v58, 1 }
 0x1db   :  { %1741 = vmatprep.subr.bf16.mxu0 %v1787_v59  ;;  %v1202_v39 = vrot.slane %v1201_v32, 2  ;;  %1260 = vbcast.lane.b32.xlu0 %v1251_v0, 256  ;;  %v1245_v19 = vrot.slane %v1244_v18, 4 }
 0x1dc   :  { %v1229_v13 = vrot.slane %v1228_v61, 2  ;;  %v1214_v2 = vadd.f32 %v1213_v4, %v1212_v58 }
 0x1dd   :  { %1714 = vmatmul.mubr.msk.bf16.vlgmr.msra.gmra.mrb[32].mxu1 %vm84_vm1, %v1933_v11  ;;  %1732 = vmatmul.mubr.msk.bf16.vlgmr.msra.gmra.mrb[32].mxu0 %vm84_vm1, %v1943_v12  ;;  %v1216_v11 = vsel %vm84_vm1, %v1172_v26, 0.0  ;;  %v1203_v46 = vadd.f32 %v1202_v39, %v1201_v32  ;;  %v1195_v12 = vrot.slane %v1194_v49, 1  ;;  %v1246_v6 = vadd.f32 %v1245_v19, %v1244_v18  ;;  %v1788_v18 = vld [vmem:[%s2163_s6] sm:$0xff]  }
 0x1de   :  { %1724 = vmatpush3.bf16.msra.mxu1 %v675_v45  ;;  %1725 = vmatprep.mubr.msk.bf16.mxu1 %vm1823_vm0, %v1822_v1  ;;  %v1217_v38 = vadd.f32 %v1216_v11, %v1215_v31  ;;  %v1230_v20 = vadd.f32 %v1229_v13, %v1228_v61  ;;  %v1254_v22 = vmul.f32 0.0625, %v1214_v2  ;;  %v1789_v2 = vld [vmem:[%s2163_s6 + $0x8] sm:$0xff]  }
 0x1df   :  { %1735 = vmatprep.subr.bf16.mxu1 %v1822_v1  ;;  %1742 = vmatpush3.bf16.msra.mxu0 %v1787_v59  ;;  %v1204_v53 = vrot.slane %v1203_v46, 1  ;;  %v1196_v63 = vadd.f32 %v1195_v12, %v1194_v49  ;;  %v1247_v26 = vrot.slane %v1246_v6, 2 }
 0x1e0   :  { %v1218_v45 = vrot.slane %v1217_v38, 4  ;;  %1264 = vbcast.lane.b32.xlu0 %v1251_v0, 264  ;;  %v1231_v24 = vrot.slane %v1230_v20, 1 }
 0x1e1   :  { %v1205_v3 = vadd.f32 %v1204_v53, %v1203_v46  ;;  %v1252_v10 = vmul.f32 0.0625, %v1196_v63  ;;  %v1248_v30 = vadd.f32 %v1247_v26, %v1246_v6 }
 0x1e2   :  { %v1219_v52 = vadd.f32 %v1218_v45, %v1217_v38  ;;  %v1232_v28 = vadd.f32 %v1231_v24, %v1230_v20 }
 0x1e3   :  { %1267 = vbcast.lane.b32.xlu1 %v1252_v10, 256  ;;  %v1253_v5 = vmul.f32 0.0625, %v1205_v3  ;;  %v1249_v11 = vrot.slane %v1248_v30, 1 }
 0x1e4   :  { %v1256_v31 = vmul.f32 0.0625, %v1232_v28 }
 0x1e5   :  { %1726 = vmatmul.mubr.msk.bf16.vlgmr.msra.gmra.mrb[36].mxu1 %vm84_vm1, %v1955_v14  ;;  %v1233_v14 = vsel %vm84_vm1, %v1175_v40, 0.0  ;;  %1274 = vbcast.lane.b32.xlu0 %v1253_v5, 256  ;;  %v1250_v34 = vadd.f32 %v1249_v11, %v1248_v30 }
 0x1e6   :  { %1736 = vmatpush3.bf16.msra.mxu1 %v677_v60  ;;  %1737 = vmatprep.mubr.msk.bf16.mxu1 %vm1823_vm0, %v1822_v1  ;;  %v1235_v55 = vadd.f32 %v1234_v48, %v1233_v14  ;;  %v1220_v60 = vrot.slane %v1219_v52, 2 }
 0x1e7   :  { %1759 = vmatprep.subr.bf16.mxu1 %v1822_v1  ;;  %1271 = vbcast.lane.b32.xlu1 %v1252_v10, 264  ;;  %v1258_v35 = vmul.f32 0.0625, %v1250_v34 }
 0x1e8   :  { %v1236_v59 = vrot.slane %v1235_v55, 4  ;;  %v1221_v7 = vadd.f32 %v1220_v60, %v1219_v52 }
 0x1e9   :  { %1281 = vbcast.lane.b32.xlu0 %v1254_v22, 256 }
 0x1ea   :  { %v1237_v15 = vadd.f32 %v1236_v59, %v1235_v55 }
 0x1eb   :  { %1278 = vbcast.lane.b32.xlu1 %v1253_v5, 264 }
 0x1ec   :  { %v1238_v21 = vrot.slane %v1237_v15, 2 }
 0x1ed   :  { %1738 = vmatmul.mubr.msk.bf16.vlgmr.msra.gmra.mrb[40].mxu1 %vm84_vm1, %v1970_v16  ;;  %v1222_v16 = vrot.slane %v1221_v7, 1 }
 0x1ee   :  { %1763 = vmatprep.mubr.msk.bf16.mxu1 %vm1823_vm0, %v1822_v1  ;;  %v1239_v25 = vadd.f32 %v1238_v21, %v1237_v15  ;;  %1760 = vmatpush3.bf16.msra.mxu1 %v1788_v18 }
 0x1ef   :  { %v1223_v23 = vadd.f32 %v1222_v16, %v1221_v7  ;;  %1285 = vbcast.lane.b32.xlu1 %v1254_v22, 264  ;;  %1761 = vmatprep.subr.bf16.mxu1 %v1822_v1  ;;  %v2102_v16 = vld [vmem:[%s2162_s5] ss:$0 sm:$0xff] }
 0x1f0   :  { %v1240_v29 = vrot.slane %v1239_v25, 1 }
 0x1f1   :  { %v1255_v27 = vmul.f32 0.0625, %v1223_v23 }
 0x1f2   :  { %v1241_v32 = vadd.f32 %v1240_v29, %v1239_v25  ;;  %1762 = vmatpush3.bf16.msra.mxu1 %v1789_v2 }
 0x1f3   :  { %1288 = vbcast.lane.b32.xlu0 %v1255_v27, 256  ;;  %1292 = vbcast.lane.b32.xlu1 %v1255_v27, 264 }
 0x1f4   :  { %v1257_v33 = vmul.f32 0.0625, %v1241_v32 }
 0x1f7   :  { %1295 = vbcast.lane.b32.xlu0 %v1256_v31, 256  ;;  %1299 = vbcast.lane.b32.xlu1 %v1256_v31, 264 }
 0x1fb   :  { %1302 = vbcast.lane.b32.xlu0 %v1257_v33, 256  ;;  %1306 = vbcast.lane.b32.xlu1 %v1257_v33, 264 }
 0x1ff   :  { %1309 = vbcast.lane.b32.xlu0 %v1258_v35, 256  ;;  %1313 = vbcast.lane.b32.xlu1 %v1258_v35, 264 }
 0x24d   :  { %v1261_v19 = vpop.permute.xlu0 %1260 }
 0x252   :  { %v1265_v21 = vpop.permute.xlu0 %1264 }
 0x255   :  { %v1268_v5 = vpop.permute.xlu1 %1267 }
 0x257   :  { %v1275_v30 = vpop.permute.xlu0 %1274 }
 0x259   :  { %v1272_v25 = vpop.permute.xlu1 %1271 }
 0x25d   :  { %v1279_v34 = vpop.permute.xlu1 %1278 }
 0x298   :  { %v712_v36 = vpop.f32.mrb[20].mxu1 }
 0x299   :  { %v1697_v37 = vpop.f32.mrb[21].mxu1 }
 0x29a   :  { %v715_v38 = vpop.f32.mrb[22].mxu1 }
 0x29b   :  { %v1006_v39 = vpack.c.bf16 %v715_v38, %v712_v36  ;;  %v1698_v8 = vpop.f32.mrb[23].mxu1 }
 0x29d   :  { %1743 = vmatprep.mubr.msk.bf16.mxu0 %vm84_vm1, %v1006_v39 }
 0x2a0   :  { %v753_v40 = vpop.f32.mrb[24].mxu1 }
 0x2a1   :  { %v1703_v41 = vpop.f32.mrb[25].mxu1 }
 0x2a2   :  { %v756_v42 = vpop.f32.mrb[26].mxu1  ;;  %v1282_v41 = vpop.permute.xlu0 %1281 }
 0x2a3   :  { %v1007_v43 = vpack.c.bf16 %v756_v42, %v753_v40  ;;  %v1704_v44 = vpop.f32.mrb[27].mxu1 }
 0x2a4   :  { %v1286_v44 = vpop.permute.xlu1 %1285 }
 0x2a5   :  { %1744 = vmatmul.mubr.msk.bf16.vlgmr.msra.gmra.mrb[36].mxu0 %vm84_vm1, %v1007_v43 }
 0x2a8   :  { %v794_v45 = vpop.f32.mrb[28].mxu1  ;;  %v876_v46 = vpop.f32.mrb[28].mxu0 }
 0x2a9   :  { %v1709_v47 = vpop.f32.mrb[29].mxu1  ;;  %v1721_v14 = vpop.f32.mrb[29].mxu0 }
 0x2aa   :  { %v797_v48 = vpop.f32.mrb[30].mxu1  ;;  %v879_v49 = vpop.f32.mrb[30].mxu0 }
 0x2ab   :  { %v1008_v50 = vpack.c.bf16 %v797_v48, %v794_v45  ;;  %v1710_v51 = vpop.f32.mrb[31].mxu1  ;;  %v1010_v52 = vpack.c.bf16 %v879_v49, %v876_v46  ;;  %v1722_v53 = vpop.f32.mrb[31].mxu0 }
 0x2ac   :  { %v1289_v49 = vpop.permute.xlu0 %1288 }
 0x2ad   :  { %1747 = vmatprep.mubr.msk.bf16.mxu0 %vm84_vm1, %v1008_v50 }
 0x2b0   :  { %v835_v54 = vpop.f32.mrb[32].mxu1  ;;  %v958_v55 = vpop.f32.mrb[32].mxu0 }
 0x2b1   :  { %v1715_v56 = vpop.f32.mrb[33].mxu1  ;;  %v1733_v12 = vpop.f32.mrb[33].mxu0 }
 0x2b2   :  { %v838_v57 = vpop.f32.mrb[34].mxu1  ;;  %v961_v58 = vpop.f32.mrb[34].mxu0 }
 0x2b3   :  { %v1009_v60 = vpack.c.bf16 %v838_v57, %v835_v54  ;;  %v1716_v61 = vpop.f32.mrb[35].mxu1  ;;  %v1012_v59 = vpack.c.bf16 %v961_v58, %v958_v55  ;;  %v1734_v62 = vpop.f32.mrb[35].mxu0 }
 0x2b4   :  { %v1293_v56 = vpop.permute.xlu1 %1292 }
 0x2b5   :  { %1748 = vmatmul.mubr.msk.bf16.gmra.mrb[40].mxu0 %vm84_vm1, %v1009_v60 }
 0x2b6   :  { %1751 = vmatprep.mubr.msk.bf16.mxu0 %vm84_vm1, %v1010_v52 }
 0x2b8   :  { %v917_v63 = vpop.f32.mrb[36].mxu1 }
 0x2b9   :  { %v1727_v0 = vpop.f32.mrb[37].mxu1 }
 0x2ba   :  { %v920_v3 = vpop.f32.mrb[38].mxu1 }
 0x2bb   :  { %v1011_v4 = vpack.c.bf16 %v920_v3, %v917_v63  ;;  %v1728_v7 = vpop.f32.mrb[39].mxu1 }
 0x2bd   :  { %1752 = vmatmul.mubr.msk.bf16.gmra.mrb[44].mxu0 %vm84_vm1, %v1011_v4 }
 0x2be   :  { %1755 = vmatprep.mubr.msk.bf16.mxu0 %vm84_vm1, %v1012_v59 }
 0x2c0   :  { %v999_v9 = vpop.f32.mrb[40].mxu1 }
 0x2c1   :  { %v1739_v10 = vpop.f32.mrb[41].mxu1 }
 0x2c2   :  { %v1002_v13 = vpop.f32.mrb[42].mxu1  ;;  %v1296_v10 = vpop.permute.xlu0 %1295 }
 0x2c3   :  { %v1013_v15 = vpack.c.bf16 %v1002_v13, %v999_v9  ;;  %v1740_v17 = vpop.f32.mrb[43].mxu1 }
 0x2c5   :  { %1756 = vmatmul.mubr.msk.bf16.gmra.mrb[48].mxu0 %vm84_vm1, %v1013_v15 }
 0x378   :  { %v1745_v20 = vpop.f32.mrb[36].mxu0 }
 0x379   :  { %v1093_v6 = vadd.f32 %v1745_v20, %v2102_v16  ;;  %v1084_v22 = vpop.f32.mrb[37].mxu0 }
 0x37a   :  { %v1085_v23 = vadd.f32 %v2102_v16, %v1084_v22  ;;  %v1746_v24 = vpop.f32.mrb[38].mxu0 }
 0x37b   :  { %v1149_v26 = vmax.f32 %v1093_v6, 0.0  ;;  %v1096_v1 = vadd.f32 %v1746_v24, %v2102_v16  ;;  %v1087_v27 = vpop.f32.mrb[39].mxu0 }
 0x37c   :  { %v1147_v28 = vmax.f32 %v1085_v23, 0.0  ;;  %v1088_v29 = vadd.f32 %v2102_v16, %v1087_v27 }
 0x37d   :  { %v1150_v31 = vmax.f32 %v1096_v1, 0.0  ;;  %v1317_v32 = vmul.f32 %v1268_v5, %v1149_v26  ;;  %v1300_v5 = vpop.permute.xlu1 %1299 }
 0x37e   :  { %v1315_v11 = vmul.f32 %v1261_v19, %v1147_v28  ;;  %v1148_v33 = vmax.f32 %v1088_v29, 0.0 }
 0x37f   :  { %v1318_v35 = vmul.f32 %v1272_v25, %v1150_v31  ;;  %v1341_v37 = vsel %vm1331_vm4, %v1317_v32, 0.0 }
 0x380   :  { %v1316_v36 = vmul.f32 %v1265_v21, %v1148_v33  ;;  %v1332_v39 = vsel %vm1331_vm4, %v1315_v11, 0.0 }
 0x381   :  { %v1342_v38 = vsel %vm1331_vm4, %v1318_v35, 0.0  ;;  %v1303_v35 = vpop.permute.xlu0 %1302 }
 0x382   :  { %v1343_v8 = vadd.f32 %v1342_v38, %v1341_v37  ;;  %v1333_v40 = vsel %vm1331_vm4, %v1316_v36, 0.0 }
 0x383   :  { %v1334_v42 = vadd.f32 %v1333_v40, %v1332_v39 }
 0x384   :  { %v1344_v43 = vrot.slane %v1343_v8, 4 }
 0x385   :  { %v1335_v45 = vrot.slane %v1334_v42, 4 }
 0x386   :  { %v1345_v46 = vadd.f32 %v1344_v43, %v1343_v8 }
 0x387   :  { %v1336_v47 = vadd.f32 %v1335_v45, %v1334_v42  ;;  %v1307_v42 = vpop.permute.xlu1 %1306 }
 0x388   :  { %v1346_v14 = vrot.slane %v1345_v46, 2  ;;  %v1749_v48 = vpop.f32.mrb[40].mxu0 }
 0x389   :  { %v1337_v50 = vrot.slane %v1336_v47, 2  ;;  %v1109_v51 = vadd.f32 %v1749_v48, %v2102_v16  ;;  %v1100_v52 = vpop.f32.mrb[41].mxu0 }
 0x38a   :  { %v1347_v53 = vadd.f32 %v1346_v14, %v1345_v46  ;;  %v1101_v54 = vadd.f32 %v2102_v16, %v1100_v52  ;;  %v1750_v55 = vpop.f32.mrb[42].mxu0 }
 0x38b   :  { %v1338_v12 = vadd.f32 %v1337_v50, %v1336_v47  ;;  %v1153_v57 = vmax.f32 %v1109_v51, 0.0  ;;  %v1112_v58 = vadd.f32 %v1750_v55, %v2102_v16  ;;  %v1103_v60 = vpop.f32.mrb[43].mxu0 }
 0x38c   :  { %v1348_v61 = vrot.slane %v1347_v53, 1  ;;  %v1151_v59 = vmax.f32 %v1101_v54, 0.0  ;;  %v1104_v62 = vadd.f32 %v2102_v16, %v1103_v60 }
 0x38d   :  { %v1339_v63 = vrot.slane %v1338_v12, 1  ;;  %v1154_v0 = vmax.f32 %v1112_v58, 0.0  ;;  %v1321_v3 = vmul.f32 %v1282_v41, %v1153_v57  ;;  %v1310_v58 = vpop.permute.xlu0 %1309 }
 0x38e   :  { %v1349_v4 = vadd.f32 %v1348_v61, %v1347_v53  ;;  %v1152_v7 = vmax.f32 %v1104_v62, 0.0  ;;  %v1319_v9 = vmul.f32 %v1275_v30, %v1151_v59 }
 0x38f   :  { %v1340_v13 = vadd.f32 %v1339_v63, %v1338_v12  ;;  %v1322_v15 = vmul.f32 %v1286_v44, %v1154_v0  ;;  %v1359_v2 = vsel %vm1331_vm4, %v1321_v3, 0.0 }
 0x390   :  { %v1405_v17 = vpack.c.bf16 %v1349_v4, %v1349_v4  ;;  %v1320_v18 = vmul.f32 %v1279_v34, %v1152_v7  ;;  %v1753_v19 = vpop.f32.mrb[44].mxu0  ;;  %v1350_v21 = vsel %vm1331_vm4, %v1319_v9, 0.0  ;;  %v1314_v7 = vpop.permute.xlu1 %1313 }
 0x391   :  { %v1404_v20 = vpack.c.bf16 %v1340_v13, %v1340_v13  ;;  %v1360_v6 = vsel %vm1331_vm4, %v1322_v15, 0.0  ;;  %v1125_v22 = vadd.f32 %v1753_v19, %v2102_v16  ;;  %v1116_v23 = vpop.f32.mrb[45].mxu0 }
 0x392   :  { %v1427_v24 = vunpack.c.l.b16 %v1405_v17  ;;  %v1351_v25 = vsel %vm1331_vm4, %v1320_v18, 0.0  ;;  %v1361_v26 = vadd.f32 %v1360_v6, %v1359_v2  ;;  %v1117_v1 = vadd.f32 %v2102_v16, %v1116_v23  ;;  %v1754_v27 = vpop.f32.mrb[46].mxu0 }
 0x393   :  { %v1426_v28 = vunpack.c.l.b16 %v1404_v20  ;;  %v1352_v29 = vadd.f32 %v1351_v25, %v1350_v21  ;;  %v1157_v30 = vmax.f32 %v1125_v22, 0.0  ;;  %v1128_v31 = vadd.f32 %v1754_v27, %v2102_v16  ;;  %v1119_v32 = vpop.f32.mrb[47].mxu0 }
 0x394   :  { %v1362_v11 = vrot.slane %v1361_v26, 4  ;;  %v1155_v33 = vmax.f32 %v1117_v1, 0.0  ;;  %v1120_v34 = vadd.f32 %v2102_v16, %v1119_v32 }
 0x395   :  { %v2125_v36 = vsel %vm1434_vm5, %v1427_v24, %v1426_v28  ;;  %v1353_v37 = vrot.slane %v1352_v29, 4  ;;  %v1158_v38 = vmax.f32 %v1128_v31, 0.0  ;;  %v1325_v39 = vmul.f32 %v1296_v10, %v1157_v30 }
 0x396   :  { %v1363_v8 = vadd.f32 %v1362_v11, %v1361_v26  ;;  %v1156_v40 = vmax.f32 %v1120_v34, 0.0  ;;  %v1323_v41 = vmul.f32 %v1289_v49, %v1155_v33 }
 0x397   :  { %v1354_v43 = vadd.f32 %v1353_v37, %v1352_v29  ;;  %v1326_v44 = vmul.f32 %v1300_v5, %v1158_v38  ;;  %v1377_v47 = vsel %vm1331_vm4, %v1325_v39, 0.0 }
 0x398   :  { %v1364_v45 = vrot.slane %v1363_v8, 2  ;;  %v1324_v46 = vmul.f32 %v1293_v56, %v1156_v40  ;;  %v1757_v14 = vpop.f32.mrb[48].mxu0  ;;  %v1368_v50 = vsel %vm1331_vm4, %v1323_v41, 0.0 }
 0x399   :  { %v1355_v48 = vrot.slane %v1354_v43, 2  ;;  %v1378_v51 = vsel %vm1331_vm4, %v1326_v44, 0.0  ;;  %v1141_v52 = vadd.f32 %v1757_v14, %v2102_v16  ;;  %v1132_v53 = vpop.f32.mrb[49].mxu0 }
 0x39a   :  { %v1365_v54 = vadd.f32 %v1364_v45, %v1363_v8  ;;  %v1369_v55 = vsel %vm1331_vm4, %v1324_v46, 0.0  ;;  %v1379_v49 = vadd.f32 %v1378_v51, %v1377_v47  ;;  %v1133_v12 = vadd.f32 %v2102_v16, %v1132_v53  ;;  %v1758_v57 = vpop.f32.mrb[50].mxu0 }
 0x39b   :  { %v1356_v56 = vadd.f32 %v1355_v48, %v1354_v43  ;;  %v1370_v60 = vadd.f32 %v1369_v55, %v1368_v50  ;;  %v1161_v61 = vmax.f32 %v1141_v52, 0.0  ;;  %v1144_v59 = vadd.f32 %v1758_v57, %v2102_v16  ;;  %v1135_v62 = vpop.f32.mrb[51].mxu0 }
 0x39c   :  { %v1366_v63 = vrot.slane %v1365_v54, 1  ;;  %v1380_v0 = vrot.slane %v1379_v49, 4  ;;  %v1159_v3 = vmax.f32 %v1133_v12, 0.0  ;;  %v1136_v4 = vadd.f32 %v2102_v16, %v1135_v62 }
 0x39d   :  { %v1357_v9 = vrot.slane %v1356_v56, 1  ;;  %v1371_v10 = vrot.slane %v1370_v60, 4  ;;  %v1162_v13 = vmax.f32 %v1144_v59, 0.0  ;;  %v1329_v15 = vmul.f32 %v1310_v58, %v1161_v61  ;;  %v1570_v59 = vld [vmem:[%s2164_s7] ss:$0 sm:$0xff] }
 0x39e   :  { %v1367_v17 = vadd.f32 %v1366_v63, %v1365_v54  ;;  %v1381_v18 = vadd.f32 %v1380_v0, %v1379_v49  ;;  %v1160_v2 = vmax.f32 %v1136_v4, 0.0  ;;  %v1327_v19 = vmul.f32 %v1303_v35, %v1159_v3 }
 0x39f   :  { %v1358_v5 = vadd.f32 %v1357_v9, %v1356_v56  ;;  %v1372_v20 = vadd.f32 %v1371_v10, %v1370_v60  ;;  %v1330_v21 = vmul.f32 %v1314_v7, %v1162_v13  ;;  %v1395_v26 = vsel %vm1331_vm4, %v1329_v15, 0.0 }
 0x3a0   :  { %v1407_v6 = vpack.c.bf16 %v1367_v17, %v1367_v17  ;;  %v1382_v22 = vrot.slane %v1381_v18, 2  ;;  %v1328_v23 = vmul.f32 %v1307_v42, %v1160_v2  ;;  %v1386_v28 = vsel %vm1331_vm4, %v1327_v19, 0.0 }
 0x3a1   :  { %v1406_v24 = vpack.c.bf16 %v1358_v5, %v1358_v5  ;;  %v1373_v25 = vrot.slane %v1372_v20, 2  ;;  %v1396_v16 = vsel %vm1331_vm4, %v1330_v21, 0.0 }
 0x3a2   :  { %v1383_v1 = vadd.f32 %v1382_v22, %v1381_v18  ;;  %v1387_v27 = vsel %vm1331_vm4, %v1328_v23, 0.0  ;;  %v1397_v29 = vadd.f32 %v1396_v16, %v1395_v26  ;;  %v1429_v11 = vunpack.c.l.b16 %v1407_v6 }
 0x3a3   :  { %v1428_v30 = vunpack.c.l.b16 %v1406_v24  ;;  %v1374_v31 = vadd.f32 %v1373_v25, %v1372_v20  ;;  %v1388_v32 = vadd.f32 %v1387_v27, %v1386_v28 }
 0x3a4   :  { %v1384_v33 = vrot.slane %v1383_v1, 1  ;;  %v1398_v34 = vrot.slane %v1397_v29, 4 }
 0x3a5   :  { %v1437_v35 = vsel %vm1436_vm6, %v1428_v30, %v2125_v36  ;;  %v1375_v37 = vrot.slane %v1374_v31, 1  ;;  %v1389_v38 = vrot.slane %v1388_v32, 4 }
 0x3a6   :  { %v1439_v39 = vsel %vm1438_vm7, %v1429_v11, %v1437_v35  ;;  %v1385_v8 = vadd.f32 %v1384_v33, %v1383_v1  ;;  %v1399_v40 = vadd.f32 %v1398_v34, %v1397_v29 }
 0x3a7   :  { %v1376_v41 = vadd.f32 %v1375_v37, %v1374_v31  ;;  %v1390_v42 = vadd.f32 %v1389_v38, %v1388_v32 }
 0x3a8   :  { %v1409_v43 = vpack.c.bf16 %v1385_v8, %v1385_v8  ;;  %v1400_v44 = vrot.slane %v1399_v40, 2 }
 0x3a9   :  { %v1408_v45 = vpack.c.bf16 %v1376_v41, %v1376_v41  ;;  %v1391_v46 = vrot.slane %v1390_v42, 2 }
 0x3aa   :  { %v1401_v47 = vadd.f32 %v1400_v44, %v1399_v40  ;;  %v1431_v50 = vunpack.c.l.b16 %v1409_v43 }
 0x3ab   :  { %v1430_v14 = vunpack.c.l.b16 %v1408_v45  ;;  %v1392_v48 = vadd.f32 %v1391_v46, %v1390_v42 }
 0x3ac   :  { %v1402_v51 = vrot.slane %v1401_v47, 1 }
 0x3ad   :  { %v1441_v52 = vsel %vm1440_vm8, %v1430_v14, %v1439_v39  ;;  %v1393_v36 = vrot.slane %v1392_v48, 1 }
 0x3ae   :  { %v1443_v53 = vsel %vm1442_vm9, %v1431_v50, %v1441_v52  ;;  %v1403_v54 = vadd.f32 %v1402_v51, %v1401_v47 }
 0x3af   :  { %v1394_v55 = vadd.f32 %v1393_v36, %v1392_v48 }
 0x3b0   :  { %v1411_v49 = vpack.c.bf16 %v1403_v54, %v1403_v54 }
 0x3b1   :  { %v1410_v12 = vpack.c.bf16 %v1394_v55, %v1394_v55 }
 0x3b2   :  { %v1433_v58 = vunpack.c.l.b16 %v1411_v49 }
 0x3b3   :  { %v1432_v57 = vunpack.c.l.b16 %v1410_v12 }
 0x3b5   :  { %v1445_v56 = vsel %vm1444_vm10, %v1432_v57, %v1443_v53 }
 0x3b6   :  { %v1447_v60 = vsel %vm1446_vm11, %v1433_v58, %v1445_v56 }
 0x3b7   :  { %v1448_v61 = vpack.c.b16 %v1447_v60, %v1447_v60 }
 0x3b9   :  { %1764 = vmatmul.mubr.msk.bf16.vlgmr.msra.gmra.mrb[44].mxu1 %vm1331_vm4, %v1448_v61 }
 0x48c   :  { %v1498_v62 = vpop.f32.mrb[44].mxu1 }
 0x48d   :  { %v1499_v63 = vadd.f32 %v1570_v59, %v1498_v62  ;;  %v1765_v0 = vpop.f32.mrb[45].mxu1 }
 0x48e   :  { %v1501_v3 = vpop.f32.mrb[46].mxu1 }
 0x48f   :  { %1504 = vst [vmem:[#allocation2] sm:$0xff] %v1499_v63  ;;  %v1766_v4 = vpop.f32.mrb[47].mxu1 }
 0x490   :  { %1809 = shalt.err (!%p1806_p4)
}
 0x491   :  { %s1810_s7 = scalar_lea.hbm %s2165_s8, 128 }
 0x492   :  { %p1811_p5 = scmp.ne.s32.totalorder %s2165_s8, %s1810_s7  ;;  %p1814_p6 = scmp.lt.u32.totalorder %s1810_s7, %s2165_s8 }
 0x494   :  { %p1816_p7 = pnand %p1814_p6, %p1811_p5 }
 0x496   :  { %1819 = shalt.err (!%p1816_p7)
}
 0x497   :  { %1514 = dma.vmem_to_hbm [thread:$0]  %s1512_s23, 128, %s2165_s8, [#allocation3]  }
 0x498   :  { %1820 = dma.done.wait [#allocation3], 128  }
 0x499   :  { %1821 = vsyncadd [#allocation3], 4294967168 }
 0x49a   :  { %1518 = vsyncpa [#allocation3], 1 }

</bundles_post_ra>
